<compile_context>
chip_gen: v5e
topology: v5e:2x2
jax: 0.10.0
libtpu: 0.0.40
codegen_flags: <defaults>
</compile_context>

<pallas_src>
import functools

import jax
import jax.numpy as jnp
from jax.experimental import pallas as pl
from jax.experimental.pallas import tpu as pltpu


# ----------------------------------------------------------------------------
# Fused Pallas kernel: the entire ResidualStack for `bb` batch elements.
# ----------------------------------------------------------------------------
def _make_stack_kernel(n_layers: int, k: int, L: int, bb: int):
    NL = bb * L  # lanes per grid step (bb batch elements x L time steps)

    def kernel(x_ref, w_ref, b_ref, res_ref, skip_ref):
        x = x_ref[...]                                       # (k, NL) f32

        # Time position within each batch element packed along the lanes.
        lane_mod = jax.lax.broadcasted_iota(jnp.int32, (k, NL), 1) % L

        skip = jnp.zeros((k, NL), jnp.float32)

        # n_layers is small -> static unroll (better LLO scheduling).
        # TODO(synk): switch to lax.fori_loop + SMEM dilation table if
        # n_layers grows past ~8 (vreg pressure from the unroll).
        for i in range(n_layers):
            d = 2 ** i
            # Dilated taps via lane roll (XLU, cheap) + per-batch-element
            # edge masks:  x_left[t] = x[t-d],  x_right[t] = x[t+d].
            x_left = jnp.where(lane_mod >= d,
                               pltpu.roll(x, d, axis=1), 0.0)
            x_right = jnp.where(lane_mod < L - d,
                                pltpu.roll(x, NL - d, axis=1), 0.0)

            # (3k, NL) bf16 activation slab for the gated-branch matmul.
            slab = jnp.concatenate([x_left, x, x_right],
                                   axis=0).astype(jnp.bfloat16)

            w = w_ref[i]                                     # (2k, 4k) bf16
            w1 = w[:, : 3 * k]                               # (2k, 3k)
            w2 = w[:, 3 * k:]                                # (2k, k)
            b_full = b_ref[i]                                # (2k, 2) f32
            b1 = b_full[:, 0:1]                              # (2k, 1)
            b2 = b_full[:, 1:2]                              # (2k, 1)

            # Both dilated convs (tanh & sigmoid branches) + all 3 taps in one
            # MXU matmul; bias as a broadcast VPU add.
            g = jnp.dot(w1, slab, preferred_element_type=jnp.float32) + b1
            branch = jnp.tanh(g[:k]) * jax.nn.sigmoid(g[k:])     # (k, NL) f32

            # Both 1x1 convs in one MXU matmul.
            h = jnp.dot(w2, branch.astype(jnp.bfloat16),
                        preferred_element_type=jnp.float32) + b2  # (2k, NL)

            x = h[:k] + x                                    # residual (f32)
            skip = skip + h[k:]                              # skip accum (f32)

        res_ref[...] = x
        skip_ref[...] = skip

    return kernel


# ----------------------------------------------------------------------------
# Host-side weight packing (done ONCE, outside the jitted call path).
# ----------------------------------------------------------------------------
def pack_residual_stack_params(params_list, k):
    """Pack all layers into one bf16 MXU operand and one f32 bias operand."""
    w_rows, b_rows = [], []
    for p in params_list:
        cin = p["w1_1"].shape[1]
        # Dilated 3-tap conv pair -> (2k, 3k): tap-major columns, cin padded
        # to k with zeros (first layer has cin = 1).
        w1 = jnp.concatenate([p["w1_1"], p["w1_2"]], axis=0)       # (2k,cin,3)
        w1 = jnp.pad(w1, ((0, 0), (0, k - cin), (0, 0)))           # (2k, k, 3)
        w1 = jnp.transpose(w1, (0, 2, 1)).reshape(2 * k, 3 * k)    # (2k, 3k)
        # 1x1 conv pair -> (2k, k).
        w2 = jnp.concatenate([p["w2_1"][:, :, 0], p["w2_2"][:, :, 0]], axis=0)
        w_rows.append(jnp.concatenate([w1, w2], axis=1))           # (2k, 4k)

        b1 = jnp.concatenate([p["b1_1"], p["b1_2"]])[:, None]      # (2k, 1)
        b2 = jnp.concatenate([p["b2_1"], p["b2_2"]])[:, None]      # (2k, 1)
        b_rows.append(jnp.concatenate([b1, b2], axis=1))           # (2k, 2)

    w_all = jnp.stack(w_rows, axis=0).astype(jnp.bfloat16)  # (nl, 2k, 4k) MXU
    b_all = jnp.stack(b_rows, axis=0).astype(jnp.float32)   # (nl, 2k, 2)  VPU
    return w_all, b_all


def _choose_batch_block(B, L, max_lanes=8 * 1024):
    """Largest divisor of B that fits the lane budget and, when possible,
    keeps >= 2 grid steps (so both v7x TensorCores are used)."""
    cap = max(1, max_lanes // L)
    divs = [d for d in range(1, B + 1) if B % d == 0 and d <= cap]
    multi = [d for d in divs if B // d >= 2]
    if multi:
        return max(multi)
    return max(divs) if divs else 1


# ----------------------------------------------------------------------------
# Wrapper: ResidualStack.forward
# ----------------------------------------------------------------------------
def residual_stack_pallas(x, w_all, b_all, *, bb=None):
    """x (B, Cin, L), packed weights -> (res (B,k,L), skip (B,k,L))."""
    n_layers = w_all.shape[0]
    k = w_all.shape[1] // 2
    B, cin, L = x.shape
    assert 2 ** (n_layers - 1) < L, "dilation must stay below sequence length"

    # is_first => Cin=1: broadcast across the k channels.  The padded weight
    # columns are zero, so the convs are unchanged, and the residual add then
    # reproduces PyTorch's (B,k,L) + (B,1,L) broadcast exactly.
    if cin != k:
        x_in = jnp.broadcast_to(x[:, :1, :], (B, k, L))
    else:
        x_in = x
    x_in = x_in.astype(jnp.float32)

    # channels -> sublanes, (batch, time) -> lanes.
    x_kl = jnp.transpose(x_in, (1, 0, 2)).reshape(k, B * L)

    if bb is None:
        bb = _choose_batch_block(B, L)
    assert B % bb == 0
    NL = bb * L
    assert NL % 128 == 0 or bb == B, "lane block must be 128-aligned"
    n_steps = B // bb

    kernel = _make_stack_kernel(n_layers, k, L, bb)

    in_specs = [
        pl.BlockSpec((k, NL), lambda b: (0, b)),                      # x
        pl.BlockSpec((n_layers, 2 * k, 4 * k), lambda b: (0, 0, 0)),  # weights
        pl.BlockSpec((n_layers, 2 * k, 2), lambda b: (0, 0, 0)),      # biases
    ]
    out_specs = (
        pl.BlockSpec((k, NL), lambda b: (0, b)),                      # residual
        pl.BlockSpec((k, NL), lambda b: (0, b)),                      # skip
    )
    out_shape = (
        jax.ShapeDtypeStruct((k, B * L), jnp.float32),
        jax.ShapeDtypeStruct((k, B * L), jnp.float32),
    )

    res_kl, skip_kl = pl.pallas_call(
        kernel,
        out_shape=out_shape,
        grid=(n_steps,),
        in_specs=in_specs,
        out_specs=out_specs,
        compiler_params=pltpu.CompilerParams(
            dimension_semantics=("parallel",)),
    )(x_kl, w_all, b_all)

    res = jnp.transpose(res_kl.reshape(k, B, L), (1, 0, 2))
    skip = jnp.transpose(skip_kl.reshape(k, B, L), (1, 0, 2))
    return res, skip


# ----------------------------------------------------------------------------
# Pure-JAX reference (for correctness check).  matmul_dtype=bf16 mirrors the
# kernel's mixed precision (bf16 MXU operands, f32 everything else).
# ----------------------------------------------------------------------------
def _conv1d_ref(x, w, b, dilation, padding, matmul_dtype=jnp.float32):
    B, _, L = x.shape
    xp = jnp.pad(x, ((0, 0), (0, 0), (padding, padding)))
    wq = w.astype(matmul_dtype).astype(jnp.float32)
    xq = xp.astype(matmul_dtype).astype(jnp.float32)
    out = jnp.broadcast_to(b[None, :, None],
                           (B, w.shape[0], L)).astype(jnp.float32)
    for j in range(w.shape[2]):
        out = out + jnp.einsum("oi,bil->bol", wq[:, :, j],
                               xq[:, :, j * dilation:j * dilation + L],
                               preferred_element_type=jnp.float32)
    return out


def _residual_block_ref(x, p, d, matmul_dtype):
    b11 = jnp.tanh(_conv1d_ref(x, p["w1_1"], p["b1_1"], d, d, matmul_dtype))
    b12 = jax.nn.sigmoid(_conv1d_ref(x, p["w1_2"], p["b1_2"], d, d, matmul_dtype))
    branch1 = b11 * b12
    out21 = _conv1d_ref(branch1, p["w2_1"], p["b2_1"], 1, 0, matmul_dtype)
    out22 = _conv1d_ref(branch1, p["w2_2"], p["b2_2"], 1, 0, matmul_dtype)
    return out21 + x, out22


def _residual_stack_ref(x, params_list, k, matmul_dtype=jnp.float32):
    B, _, L = x.shape
    skip_out = jnp.zeros((B, k, L), jnp.float32)
    for i, p in enumerate(params_list):
        x, s = _residual_block_ref(x, p, 2 ** i, matmul_dtype)
        skip_out = skip_out + s
    return x, skip_out


# ----------------------------------------------------------------------------
# Deterministic parameter init (shapes per ResidualBlock.__init__)
# ----------------------------------------------------------------------------
def init_params(key, k, n_layers, is_first):
    params_list = []
    for i in range(n_layers):
        in_ch = 1 if (i == 0 and is_first) else k
        keys = jax.random.split(jax.random.fold_in(key, i), 8)
        scale = 0.3
        p = {
            "w1_1": scale * jax.random.normal(keys[0], (k, in_ch, 3), jnp.float32),
            "b1_1": scale * jax.random.normal(keys[1], (k,), jnp.float32),
            "w1_2": scale * jax.random.normal(keys[2], (k, in_ch, 3), jnp.float32),
            "b1_2": scale * jax.random.normal(keys[3], (k,), jnp.float32),
            "w2_1": scale * jax.random.normal(keys[4], (k, k, 1), jnp.float32),
            "b2_1": scale * jax.random.normal(keys[5], (k,), jnp.float32),
            "w2_2": scale * jax.random.normal(keys[6], (k, k, 1), jnp.float32),
            "b2_2": scale * jax.random.normal(keys[7], (k,), jnp.float32),
        }
        params_list.append(p)
    return params_list


if __name__ == "__main__":
    # ResidualStack(k=8, n_layers=3, is_first=True): input has 1 channel.
    B, k, L, n_layers, is_first = 2, 8, 128, 3, True

    key = jax.random.PRNGKey(0)
    kx, kp = jax.random.split(key)
    x = jax.random.normal(kx, (B, 1, L), jnp.float32)
    params_list = init_params(kp, k, n_layers, is_first)

    # Pack weights ONCE, host-side, outside the per-call jit path.
    w_all, b_all = pack_residual_stack_params(params_list, k)

    fwd = jax.jit(residual_stack_pallas)
    res_out, skip_out = fwd(x, w_all, b_all)
    jax.block_until_ready((res_out, skip_out))

    # Tight check vs. a reference with the same mixed-precision policy
    # (bf16 MXU operands, f32 accumulation / nonlinearities / residual+skip).
    res_ref, skip_ref = _residual_stack_ref(x, params_list, k,
                                            matmul_dtype=jnp.bfloat16)
    # Loose sanity check vs. the full-f32 reference.
    res_f32, skip_f32 = _residual_stack_ref(x, params_list, k,
                                            matmul_dtype=jnp.float32)

    assert res_out.shape == (B, k, L) and skip_out.shape == (B, k, L)
    assert jnp.allclose(res_out, res_ref, rtol=1e-2, atol=1e-2)
    assert jnp.allclose(skip_out, skip_ref, rtol=1e-2, atol=1e-2)
    assert jnp.allclose(res_out, res_f32, rtol=1e-1, atol=1e-1)
    assert jnp.allclose(skip_out, skip_f32, rtol=1e-1, atol=1e-1)
    print("KERNEL_OK")
</pallas_src>

<mosaic_0001>
module attributes {stable_mosaic.version = 11 : i64} {
  func.func @kernel(%arg0: i32, %arg1: memref<8x128xf32, #tpu.memory_space<vmem>>, %arg2: memref<3x16x32xbf16, #tpu.memory_space<vmem>>, %arg3: memref<3x16x2xf32, #tpu.memory_space<vmem>>, %arg4: memref<8x128xf32, #tpu.memory_space<vmem>>, %arg5: memref<8x128xf32, #tpu.memory_space<vmem>>) attributes {dimension_semantics = [#tpu.dimension_semantics<parallel>], iteration_bounds = array<i64: 2>, scalar_prefetch = 0 : i64, scratch_operands = 0 : i64, tpu.core_type = #tpu.core_type<tc>, window_params = [{transform_indices = @transform_0, window_bounds = array<i64: 8, 128>}, {pipeline_mode = #tpu.pipeline_mode<synchronous>, transform_indices = @transform_1, window_bounds = array<i64: 3, 16, 32>}, {pipeline_mode = #tpu.pipeline_mode<synchronous>, transform_indices = @transform_2, window_bounds = array<i64: 3, 16, 2>}, {transform_indices = @transform_3, window_bounds = array<i64: 8, 128>}, {transform_indices = @transform_4, window_bounds = array<i64: 8, 128>}]} {
    %c0 = arith.constant 0 : index
    %c0_0 = arith.constant 0 : index
    %0 = vector.load %arg1[%c0, %c0_0] : memref<8x128xf32, #tpu.memory_space<vmem>>, vector<8x128xf32>
    %1 = tpu.iota {dimensions = array<i32: 1>} : vector<8x128xi32>
    %c128_i32 = arith.constant 128 : i32
    %c0_i32 = arith.constant 0 : i32
    %2 = arith.cmpi eq, %c128_i32, %c0_i32 : i32
    %c1_i32 = arith.constant 1 : i32
    %3 = arith.select %2, %c1_i32, %c128_i32 : i32
    %4 = vector.broadcast %3 : i32 to vector<8x128xi32>
    %5 = arith.remsi %1, %4 : vector<8x128xi32>
    %c0_i32_1 = arith.constant 0 : i32
    %6 = vector.broadcast %c0_i32_1 : i32 to vector<8x128xi32>
    %7 = arith.cmpi ne, %5, %6 : vector<8x128xi32>
    %c0_i32_2 = arith.constant 0 : i32
    %8 = vector.broadcast %c0_i32_2 : i32 to vector<8x128xi32>
    %9 = arith.cmpi slt, %5, %8 : vector<8x128xi32>
    %c0_i32_3 = arith.constant 0 : i32
    %10 = arith.cmpi slt, %3, %c0_i32_3 : i32
    %11 = vector.broadcast %10 : i1 to vector<8x128xi1>
    %12 = vector.broadcast %11 : vector<8x128xi1> to vector<8x128xi1>
    %13 = arith.xori %9, %12 : vector<8x128xi1>
    %14 = arith.andi %13, %7 : vector<8x128xi1>
    %15 = vector.broadcast %3 : i32 to vector<8x128xi32>
    %16 = arith.addi %5, %15 : vector<8x128xi32>
    %17 = arith.select %14, %16, %5 : vector<8x128xi1>, vector<8x128xi32>
    %cst = arith.constant 0.000000e+00 : f32
    %18 = vector.broadcast %cst : f32 to vector<8x128xf32>
    %c1_i32_4 = arith.constant 1 : i32
    %19 = vector.broadcast %c1_i32_4 : i32 to vector<8x128xi32>
    %20 = arith.cmpi sge, %17, %19 : vector<8x128xi32>
    %c1_i32_5 = arith.constant 1 : i32
    %21 = tpu.dynamic_rotate %0 by %c1_i32_5 dim 1 : vector<8x128xf32>, i32 -> vector<8x128xf32>
    %cst_6 = arith.constant 0.000000e+00 : f32
    %22 = vector.broadcast %cst_6 : f32 to vector<8x128xf32>
    %23 = arith.select %20, %21, %22 : vector<8x128xi1>, vector<8x128xf32>
    %c127_i32 = arith.constant 127 : i32
    %24 = vector.broadcast %c127_i32 : i32 to vector<8x128xi32>
    %25 = arith.cmpi slt, %17, %24 : vector<8x128xi32>
    %c127_i32_7 = arith.constant 127 : i32
    %26 = tpu.dynamic_rotate %0 by %c127_i32_7 dim 1 : vector<8x128xf32>, i32 -> vector<8x128xf32>
    %cst_8 = arith.constant 0.000000e+00 : f32
    %27 = vector.broadcast %cst_8 : f32 to vector<8x128xf32>
    %28 = arith.select %25, %26, %27 : vector<8x128xi1>, vector<8x128xf32>
    %29 = tpu.concatenate %23, %0, %28 in 0 : vector<8x128xf32>, vector<8x128xf32>, vector<8x128xf32> -> vector<24x128xf32>
    %30 = arith.truncf %29 : vector<24x128xf32> to vector<24x128xbf16>
    %c0_9 = arith.constant 0 : index
    %c0_10 = arith.constant 0 : index
    %c0_11 = arith.constant 0 : index
    %31 = vector.load %arg2[%c0_9, %c0_10, %c0_11] : memref<3x16x32xbf16, #tpu.memory_space<vmem>>, vector<1x16x32xbf16>
    %32 = vector.shape_cast %31 : vector<1x16x32xbf16> to vector<16x32xbf16>
    %33 = vector.extract_strided_slice %32 {offsets = [0, 0], sizes = [16, 24], strides = [1, 1]} : vector<16x32xbf16> to vector<16x24xbf16>
    %34 = vector.extract_strided_slice %32 {offsets = [0, 24], sizes = [16, 8], strides = [1, 1]} : vector<16x32xbf16> to vector<16x8xbf16>
    %c0_12 = arith.constant 0 : index
    %c0_13 = arith.constant 0 : index
    %c0_14 = arith.constant 0 : index
    %35 = vector.load %arg3[%c0_12, %c0_13, %c0_14] : memref<3x16x2xf32, #tpu.memory_space<vmem>>, vector<1x16x2xf32>
    %36 = vector.shape_cast %35 : vector<1x16x2xf32> to vector<16x2xf32>
    %37 = vector.extract_strided_slice %36 {offsets = [0, 0], sizes = [16, 1], strides = [1, 1]} : vector<16x2xf32> to vector<16x1xf32>
    %38 = vector.extract_strided_slice %36 {offsets = [0, 1], sizes = [16, 1], strides = [1, 1]} : vector<16x2xf32> to vector<16x1xf32>
    %cst_15 = arith.constant dense<0.000000e+00> : vector<16x128xf32>
    %39 = tpu.matmul %33, %30, %cst_15 {dimension_numbers = #tpu.dot_dimension_numbers<[1], [0], [0], [1], [0, 0, 1, 1], [], []>} : vector<16x24xbf16>, vector<24x128xbf16>, vector<16x128xf32> -> vector<16x128xf32>
    %40 = vector.broadcast %37 : vector<16x1xf32> to vector<16x128xf32>
    %41 = arith.addf %39, %40 : vector<16x128xf32>
    %42 = vector.extract_strided_slice %41 {offsets = [0, 0], sizes = [8, 128], strides = [1, 1]} : vector<16x128xf32> to vector<8x128xf32>
    %43 = math.tanh %42 : vector<8x128xf32>
    %44 = vector.extract_strided_slice %41 {offsets = [8, 0], sizes = [8, 128], strides = [1, 1]} : vector<16x128xf32> to vector<8x128xf32>
    %45 = arith.negf %44 : vector<8x128xf32>
    %46 = math.exp %45 : vector<8x128xf32>
    %cst_16 = arith.constant 1.000000e+00 : f32
    %47 = vector.broadcast %cst_16 : f32 to vector<8x128xf32>
    %48 = arith.addf %47, %46 : vector<8x128xf32>
    %49 = arith.divf %47, %48 : vector<8x128xf32>
    %50 = arith.mulf %43, %49 : vector<8x128xf32>
    %51 = arith.truncf %50 : vector<8x128xf32> to vector<8x128xbf16>
    %cst_17 = arith.constant dense<0.000000e+00> : vector<16x128xf32>
    %52 = tpu.matmul %34, %51, %cst_17 {dimension_numbers = #tpu.dot_dimension_numbers<[1], [0], [0], [1], [0, 0, 1, 1], [], []>} : vector<16x8xbf16>, vector<8x128xbf16>, vector<16x128xf32> -> vector<16x128xf32>
    %53 = vector.broadcast %38 : vector<16x1xf32> to vector<16x128xf32>
    %54 = arith.addf %52, %53 : vector<16x128xf32>
    %55 = vector.extract_strided_slice %54 {offsets = [0, 0], sizes = [8, 128], strides = [1, 1]} : vector<16x128xf32> to vector<8x128xf32>
    %56 = arith.addf %55, %0 : vector<8x128xf32>
    %57 = vector.extract_strided_slice %54 {offsets = [8, 0], sizes = [8, 128], strides = [1, 1]} : vector<16x128xf32> to vector<8x128xf32>
    %58 = arith.addf %18, %57 : vector<8x128xf32>
    %c2_i32 = arith.constant 2 : i32
    %59 = vector.broadcast %c2_i32 : i32 to vector<8x128xi32>
    %60 = arith.cmpi sge, %17, %59 : vector<8x128xi32>
    %c2_i32_18 = arith.constant 2 : i32
    %61 = tpu.dynamic_rotate %56 by %c2_i32_18 dim 1 : vector<8x128xf32>, i32 -> vector<8x128xf32>
    %cst_19 = arith.constant 0.000000e+00 : f32
    %62 = vector.broadcast %cst_19 : f32 to vector<8x128xf32>
    %63 = arith.select %60, %61, %62 : vector<8x128xi1>, vector<8x128xf32>
    %c126_i32 = arith.constant 126 : i32
    %64 = vector.broadcast %c126_i32 : i32 to vector<8x128xi32>
    %65 = arith.cmpi slt, %17, %64 : vector<8x128xi32>
    %c126_i32_20 = arith.constant 126 : i32
    %66 = tpu.dynamic_rotate %56 by %c126_i32_20 dim 1 : vector<8x128xf32>, i32 -> vector<8x128xf32>
    %cst_21 = arith.constant 0.000000e+00 : f32
    %67 = vector.broadcast %cst_21 : f32 to vector<8x128xf32>
    %68 = arith.select %65, %66, %67 : vector<8x128xi1>, vector<8x128xf32>
    %69 = tpu.concatenate %63, %56, %68 in 0 : vector<8x128xf32>, vector<8x128xf32>, vector<8x128xf32> -> vector<24x128xf32>
    %70 = arith.truncf %69 : vector<24x128xf32> to vector<24x128xbf16>
    %c1 = arith.constant 1 : index
    %c0_22 = arith.constant 0 : index
    %c0_23 = arith.constant 0 : index
    %71 = vector.load %arg2[%c1, %c0_22, %c0_23] : memref<3x16x32xbf16, #tpu.memory_space<vmem>>, vector<1x16x32xbf16>
    %72 = vector.shape_cast %71 : vector<1x16x32xbf16> to vector<16x32xbf16>
    %73 = vector.extract_strided_slice %72 {offsets = [0, 0], sizes = [16, 24], strides = [1, 1]} : vector<16x32xbf16> to vector<16x24xbf16>
    %74 = vector.extract_strided_slice %72 {offsets = [0, 24], sizes = [16, 8], strides = [1, 1]} : vector<16x32xbf16> to vector<16x8xbf16>
    %c1_24 = arith.constant 1 : index
    %c0_25 = arith.constant 0 : index
    %c0_26 = arith.constant 0 : index
    %75 = vector.load %arg3[%c1_24, %c0_25, %c0_26] : memref<3x16x2xf32, #tpu.memory_space<vmem>>, vector<1x16x2xf32>
    %76 = vector.shape_cast %75 : vector<1x16x2xf32> to vector<16x2xf32>
    %77 = vector.extract_strided_slice %76 {offsets = [0, 0], sizes = [16, 1], strides = [1, 1]} : vector<16x2xf32> to vector<16x1xf32>
    %78 = vector.extract_strided_slice %76 {offsets = [0, 1], sizes = [16, 1], strides = [1, 1]} : vector<16x2xf32> to vector<16x1xf32>
    %cst_27 = arith.constant dense<0.000000e+00> : vector<16x128xf32>
    %79 = tpu.matmul %73, %70, %cst_27 {dimension_numbers = #tpu.dot_dimension_numbers<[1], [0], [0], [1], [0, 0, 1, 1], [], []>} : vector<16x24xbf16>, vector<24x128xbf16>, vector<16x128xf32> -> vector<16x128xf32>
    %80 = vector.broadcast %77 : vector<16x1xf32> to vector<16x128xf32>
    %81 = arith.addf %79, %80 : vector<16x128xf32>
    %82 = vector.extract_strided_slice %81 {offsets = [0, 0], sizes = [8, 128], strides = [1, 1]} : vector<16x128xf32> to vector<8x128xf32>
    %83 = math.tanh %82 : vector<8x128xf32>
    %84 = vector.extract_strided_slice %81 {offsets = [8, 0], sizes = [8, 128], strides = [1, 1]} : vector<16x128xf32> to vector<8x128xf32>
    %85 = arith.negf %84 : vector<8x128xf32>
    %86 = math.exp %85 : vector<8x128xf32>
    %cst_28 = arith.constant 1.000000e+00 : f32
    %87 = vector.broadcast %cst_28 : f32 to vector<8x128xf32>
    %88 = arith.addf %87, %86 : vector<8x128xf32>
    %89 = arith.divf %87, %88 : vector<8x128xf32>
    %90 = arith.mulf %83, %89 : vector<8x128xf32>
    %91 = arith.truncf %90 : vector<8x128xf32> to vector<8x128xbf16>
    %cst_29 = arith.constant dense<0.000000e+00> : vector<16x128xf32>
    %92 = tpu.matmul %74, %91, %cst_29 {dimension_numbers = #tpu.dot_dimension_numbers<[1], [0], [0], [1], [0, 0, 1, 1], [], []>} : vector<16x8xbf16>, vector<8x128xbf16>, vector<16x128xf32> -> vector<16x128xf32>
    %93 = vector.broadcast %78 : vector<16x1xf32> to vector<16x128xf32>
    %94 = arith.addf %92, %93 : vector<16x128xf32>
    %95 = vector.extract_strided_slice %94 {offsets = [0, 0], sizes = [8, 128], strides = [1, 1]} : vector<16x128xf32> to vector<8x128xf32>
    %96 = arith.addf %95, %56 : vector<8x128xf32>
    %97 = vector.extract_strided_slice %94 {offsets = [8, 0], sizes = [8, 128], strides = [1, 1]} : vector<16x128xf32> to vector<8x128xf32>
    %98 = arith.addf %58, %97 : vector<8x128xf32>
    %c4_i32 = arith.constant 4 : i32
    %99 = vector.broadcast %c4_i32 : i32 to vector<8x128xi32>
    %100 = arith.cmpi sge, %17, %99 : vector<8x128xi32>
    %c4_i32_30 = arith.constant 4 : i32
    %101 = tpu.dynamic_rotate %96 by %c4_i32_30 dim 1 : vector<8x128xf32>, i32 -> vector<8x128xf32>
    %cst_31 = arith.constant 0.000000e+00 : f32
    %102 = vector.broadcast %cst_31 : f32 to vector<8x128xf32>
    %103 = arith.select %100, %101, %102 : vector<8x128xi1>, vector<8x128xf32>
    %c124_i32 = arith.constant 124 : i32
    %104 = vector.broadcast %c124_i32 : i32 to vector<8x128xi32>
    %105 = arith.cmpi slt, %17, %104 : vector<8x128xi32>
    %c124_i32_32 = arith.constant 124 : i32
    %106 = tpu.dynamic_rotate %96 by %c124_i32_32 dim 1 : vector<8x128xf32>, i32 -> vector<8x128xf32>
    %cst_33 = arith.constant 0.000000e+00 : f32
    %107 = vector.broadcast %cst_33 : f32 to vector<8x128xf32>
    %108 = arith.select %105, %106, %107 : vector<8x128xi1>, vector<8x128xf32>
    %109 = tpu.concatenate %103, %96, %108 in 0 : vector<8x128xf32>, vector<8x128xf32>, vector<8x128xf32> -> vector<24x128xf32>
    %110 = arith.truncf %109 : vector<24x128xf32> to vector<24x128xbf16>
    %c2 = arith.constant 2 : index
    %c0_34 = arith.constant 0 : index
    %c0_35 = arith.constant 0 : index
    %111 = vector.load %arg2[%c2, %c0_34, %c0_35] : memref<3x16x32xbf16, #tpu.memory_space<vmem>>, vector<1x16x32xbf16>
    %112 = vector.shape_cast %111 : vector<1x16x32xbf16> to vector<16x32xbf16>
    %113 = vector.extract_strided_slice %112 {offsets = [0, 0], sizes = [16, 24], strides = [1, 1]} : vector<16x32xbf16> to vector<16x24xbf16>
    %114 = vector.extract_strided_slice %112 {offsets = [0, 24], sizes = [16, 8], strides = [1, 1]} : vector<16x32xbf16> to vector<16x8xbf16>
    %c2_36 = arith.constant 2 : index
    %c0_37 = arith.constant 0 : index
    %c0_38 = arith.constant 0 : index
    %115 = vector.load %arg3[%c2_36, %c0_37, %c0_38] : memref<3x16x2xf32, #tpu.memory_space<vmem>>, vector<1x16x2xf32>
    %116 = vector.shape_cast %115 : vector<1x16x2xf32> to vector<16x2xf32>
    %117 = vector.extract_strided_slice %116 {offsets = [0, 0], sizes = [16, 1], strides = [1, 1]} : vector<16x2xf32> to vector<16x1xf32>
    %118 = vector.extract_strided_slice %116 {offsets = [0, 1], sizes = [16, 1], strides = [1, 1]} : vector<16x2xf32> to vector<16x1xf32>
    %cst_39 = arith.constant dense<0.000000e+00> : vector<16x128xf32>
    %119 = tpu.matmul %113, %110, %cst_39 {dimension_numbers = #tpu.dot_dimension_numbers<[1], [0], [0], [1], [0, 0, 1, 1], [], []>} : vector<16x24xbf16>, vector<24x128xbf16>, vector<16x128xf32> -> vector<16x128xf32>
    %120 = vector.broadcast %117 : vector<16x1xf32> to vector<16x128xf32>
    %121 = arith.addf %119, %120 : vector<16x128xf32>
    %122 = vector.extract_strided_slice %121 {offsets = [0, 0], sizes = [8, 128], strides = [1, 1]} : vector<16x128xf32> to vector<8x128xf32>
    %123 = math.tanh %122 : vector<8x128xf32>
    %124 = vector.extract_strided_slice %121 {offsets = [8, 0], sizes = [8, 128], strides = [1, 1]} : vector<16x128xf32> to vector<8x128xf32>
    %125 = arith.negf %124 : vector<8x128xf32>
    %126 = math.exp %125 : vector<8x128xf32>
    %cst_40 = arith.constant 1.000000e+00 : f32
    %127 = vector.broadcast %cst_40 : f32 to vector<8x128xf32>
    %128 = arith.addf %127, %126 : vector<8x128xf32>
    %129 = arith.divf %127, %128 : vector<8x128xf32>
    %130 = arith.mulf %123, %129 : vector<8x128xf32>
    %131 = arith.truncf %130 : vector<8x128xf32> to vector<8x128xbf16>
    %cst_41 = arith.constant dense<0.000000e+00> : vector<16x128xf32>
    %132 = tpu.matmul %114, %131, %cst_41 {dimension_numbers = #tpu.dot_dimension_numbers<[1], [0], [0], [1], [0, 0, 1, 1], [], []>} : vector<16x8xbf16>, vector<8x128xbf16>, vector<16x128xf32> -> vector<16x128xf32>
    %133 = vector.broadcast %118 : vector<16x1xf32> to vector<16x128xf32>
    %134 = arith.addf %132, %133 : vector<16x128xf32>
    %135 = vector.extract_strided_slice %134 {offsets = [0, 0], sizes = [8, 128], strides = [1, 1]} : vector<16x128xf32> to vector<8x128xf32>
    %136 = arith.addf %135, %96 : vector<8x128xf32>
    %137 = vector.extract_strided_slice %134 {offsets = [8, 0], sizes = [8, 128], strides = [1, 1]} : vector<16x128xf32> to vector<8x128xf32>
    %138 = arith.addf %98, %137 : vector<8x128xf32>
    %c0_42 = arith.constant 0 : index
    %c0_43 = arith.constant 0 : index
    %139 = vector.load %arg4[%c0_42, %c0_43] : memref<8x128xf32, #tpu.memory_space<vmem>>, vector<8x128xf32>
    tpu.vector_store %arg4[%c0_42, %c0_43], %136 {strides = array<i32>} : memref<8x128xf32, #tpu.memory_space<vmem>>, vector<8x128xf32>,
    %c0_44 = arith.constant 0 : index
    %c0_45 = arith.constant 0 : index
    %140 = vector.load %arg5[%c0_44, %c0_45] : memref<8x128xf32, #tpu.memory_space<vmem>>, vector<8x128xf32>
    tpu.vector_store %arg5[%c0_44, %c0_45], %138 {strides = array<i32>} : memref<8x128xf32, #tpu.memory_space<vmem>>, vector<8x128xf32>,
    return
  }
  func.func @transform_0(%arg0: i32) -> (i32, i32) {
    %c0_i32 = arith.constant 0 : i32
    %c0_i32_0 = arith.constant 0 : i32
    return %c0_i32, %arg0 : i32, i32
  }
  func.func @transform_1(%arg0: i32) -> (i32, i32, i32) {
    %c0_i32 = arith.constant 0 : i32
    %c0_i32_0 = arith.constant 0 : i32
    %c0_i32_1 = arith.constant 0 : i32
    %c0_i32_2 = arith.constant 0 : i32
    return %c0_i32, %c0_i32_0, %c0_i32_1 : i32, i32, i32
  }
  func.func @transform_2(%arg0: i32) -> (i32, i32, i32) {
    %c0_i32 = arith.constant 0 : i32
    %c0_i32_0 = arith.constant 0 : i32
    %c0_i32_1 = arith.constant 0 : i32
    %c0_i32_2 = arith.constant 0 : i32
    return %c0_i32, %c0_i32_0, %c0_i32_1 : i32, i32, i32
  }
  func.func @transform_3(%arg0: i32) -> (i32, i32) {
    %c0_i32 = arith.constant 0 : i32
    %c0_i32_0 = arith.constant 0 : i32
    return %c0_i32, %arg0 : i32, i32
  }
  func.func @transform_4(%arg0: i32) -> (i32, i32) {
    %c0_i32 = arith.constant 0 : i32
    %c0_i32_0 = arith.constant 0 : i32
    return %c0_i32, %arg0 : i32, i32
  }
}

</mosaic_0001>

<bundles_post_ra>
// kernel: residual_stack_pallas.1
= control target key start
LH: loop header
LB: loop body
LE: loop exit
PB: predicated region body
PF: predicated region fallthrough
CT: control target
= control target key end

     0   :  { %10 = vsyncpa [#allocation3], 0  ;;  %s1122_s0 = inlined_call_operand.vmem [shape: f32[8,256], index: 0, kind: input, shape index: {}]   ;;  %s1123_s1 = inlined_call_operand.vmem [shape: bf16[3,16,32], index: 1, kind: input, shape index: {}]   ;;  %s1124_s2 = inlined_call_operand.vmem [shape: f32[3,16,2], index: 2, kind: input, shape index: {}]   ;;  %s1125_s3 = inlined_call_operand.hbm [shape: f32[8,256], index: 3, kind: output, shape index: {0}]   ;;  %s1126_s4 = inlined_call_operand.hbm [shape: f32[8,256], index: 4, kind: output, shape index: {1}]  }
   0x1   :  { %12 = vsyncpa [#allocation3 + $0x1], 0 }
   0x2   :  { %13 = vsyncpa [#allocation5], 0 }
   0x3   :  { %15 = vsyncpa [#allocation5 + $0x1], 0  ;;  %s929_s15 = smov 0   ;;  %s931_s16 = smov 0  }
   0x4   :  { %s933_s17 = smov 0   ;;  %s935_s18 = smov 0  }
   0x5 LB: > { %s950_s19 = sadd.s32 4294967295, %s892_s18   ;;  %s665_s20 = sadd.s32 4294967294, %s892_s18   ;;  %s892_s18 = sphi %s935_s18, %s1132_s18   ;;  %s888_s17 = sphi %s933_s17, %s1131_s17   ;;  %s884_s16 = sphi %s931_s16, %s1130_s16   ;;  %s880_s15 = sphi %s929_s15, %s1129_s15  }
   0x6   : > { %s954_s21 = sadd.s32 1, %s892_s18   ;;  %s96_s22 = sadd.s32 1, %s888_s17 }
   0x7   : > { %s93_s23 = ssub.s32 %s892_s18, %s954_s21  ;;  %p106_p0 = scmp.ne.s32.totalorder %s888_s17, %s884_s16 }
   0x8   : > { %p94_p1 = scmp.eq.s32.totalorder %s93_s23, 0  ;;  %p107_p2 = scmp.eq.s32.totalorder %s950_s19, 1 }
   0x9   : > { %p112_p3 = scmp.ne.s32.totalorder %s884_s16, %s880_s15  ;;  %p113_p4 = scmp.eq.s32.totalorder %s665_s20, 1 }
   0xa   : > { %s965_s24 = scalar_select %p94_p1, %s888_s17, %s96_s22  }
   0xb   : > { %p967_p5 = por %p107_p2, %p106_p0  ;;  %p971_p6 = por %p113_p4, %p112_p3 }
   0xc   : > { %p668_p7 = scmp.ge.s32.totalorder %s892_s18, 1  ;;  %p170_p8 = scmp.lt.s32.totalorder %s892_s18, 3 }
   0xe   : > { %p171_p9 = pnand %p668_p7, %p170_p8 }
   0xf   : > { %p200_p10 = scmp.lt.s32.totalorder (!%p171_p9), %s950_s19, 1  ;;  %s894_s6 = smov (!%p171_p9), 127  }
  0x10   : > { %174 = sbr.rel (%p171_p9) target bundleno = 1347 (0x543), region = 32  ;;  %s895_s7 = smov (!%p171_p9), 1  }
  0x11   : > { %s896_s10 = smov (!%p171_p9), 104   ;;  %s900_s20 = smov (!%p171_p9), 2  }
  0x12   : > { %s901_s22 = smov (!%p171_p9), 126   ;;  %s902_s8 = smov (!%p171_p9), 4  }
  0x13   : > { %s903_s9 = smov (!%p171_p9), 124   ;;  %s818_s14 = scalar_lea.hbm (!%p171_p9), %s1125_s3, 16 }
  0x15   : > { %s201_s27 = scalar_select %p200_p10, %s950_s19, 1  ;;  %v716_v1 = vld [vmem:[%s1123_s1] sm:$0xff]  ;;  %v993_v2 = vld [vmem:[%s1124_s2 + $0x8] sm:$0xff]  ;;  %v897_v3 = vmov 0   ;;  %v206_v5 = vlaneseq  ;;  %vm253_vm1 = vcmask 1043456   ;;  %vm898_vm3 = vmmov 1  }
  0x16   : > { %301 = vrot.lane.b32.xlu2 %v716_v1, %s896_s10  ;;  %773 = vset.pattern.permute.xlu1 %v897_v3  ;;  %v232_v4 = vld [vmem:[%s1124_s2] sm:$0xff]  ;;  %vm249_vm5 = vcmask 195584   ;;  %v899_v18 = vmov 1   ;;  %vm303_vm10 = vcmask 64512   ;;  %v684_v42 = vld [vmem:[%s1124_s2 + $0x10] sm:$0xff]  ;;  %v1021_v43 = vld [vmem:[%s1124_s2 + $0x28] sm:$0xff] }
  0x17   : > { %s671_s28 = sshll.u32 %s201_s27, 3  ;;  %776 = vset.pattern.permute.xlu0 %v897_v3  ;;  %241 = vperm.xlu1 %773, %v993_v2   ;;  %v999_v6 = vand.u32 127, %v206_v5  ;;  %v717_v44 = vld [vmem:[%s1123_s1 + $0x8] sm:$0xff]  ;;  %v685_v45 = vld [vmem:[%s1124_s2 + $0x18] sm:$0xff] }
  0x18   : > { %s203_s5 = scalar_lea.vmem %s1122_s0, %s671_s28  ;;  %774 = vset.pattern.permute.xlu2 %v899_v18 }
  0x19   : > { %v982_v0 = vld [vmem:[%s203_s5] sm:$0xff]  ;;  %vm224_vm0 = vcmp.lt.s32.totalorder %v999_v6, 127  ;;  %vm220_vm2 = vcmp.ge.s32.totalorder %v999_v6, 1  ;;  %vm330_vm11 = vcmp.lt.s32.totalorder %v999_v6, 126  ;;  %vm326_vm12 = vcmp.ge.s32.totalorder %v999_v6, 2 }
  0x1a   : > { %225 = vrot.lane.b32.xlu0 %v982_v0, %s894_s6  ;;  %vm676_vm4 = vmpackc.low %vm898_vm3, %vm220_vm2 }
  0x1b   : > { %vm690_vm13 = vmpackc.low %vm898_vm3, %vm326_vm12 }
  0x1e   : > { %294 = vperm.xlu2 %774, %v232_v4  }
  0x1f   : > { %236 = vperm.xlu1 %773, %v232_v4  }
  0x22   : > { %221 = vrot.lane.b32.xlu0 %v982_v0, %s895_s7 }
  0x26   : > { %775 = vset.pattern.permute.xlu2 %v897_v3 }
  0x27   : > { %349 = vperm.xlu2 %775, %v685_v45  }
  0x2f   : > { %777 = vset.pattern.permute.xlu2 %v899_v18 }
  0x30   : > { %400 = vperm.xlu2 %777, %v684_v42  }
  0x70   : > { %v302_v37 = vpop.permute.xlu2 %301 }
  0x78   : > { %v295_v38 = vpop.permute.xlu2 %294 }
  0x81   : > { %v350_v53 = vpop.permute.xlu2 %349 }
  0x89   : > { %v242_v14 = vpop.permute.xlu1 %241 }
  0x8c   : > { %v226_v7 = vpop.permute.xlu0 %225 }
  0x8d   : > { %v227_v8 = vsel %vm224_vm0, %v226_v7, 0.0 }
  0x8e   : > { %v229_v9 = vpack.c.bf16 %v227_v8, %v227_v8 }
  0x90   : > { %v255_v10 = vsel %vm253_vm1, %v229_v9, 0 }
  0x91   : > { %263 = vmatpush.bf16.msra.mxu0 %v255_v10  ;;  %v237_v21 = vpop.permute.xlu1 %236 }
  0x94   : > { %v222_v11 = vpop.permute.xlu0 %221 }
  0x95   : > { %v677_v12 = vpack.c.bf16 %v982_v0, %v222_v11 }
  0x97   : > { %678 = vmatpush.bf16.msk.msra.mxu0 %vm676_vm4, %v677_v12  ;;  %vm435_vm4 = vcmp.lt.s32.totalorder %v999_v6, 124 }
  0x9a   : > { %679 = vmatmul.msk.bf16.vlgmr.msra.gmra.mxu0 %vm249_vm5, %v716_v1 }
 0x117   : > { %v266_v13 = vpop.f32.mrf.mxu0 }
 0x118   : > { %v267_v23 = vadd.f32 %v266_v13, %v237_v21  ;;  %v401_v13 = vpop.permute.xlu2 %400 }
 0x11f   : > { %v268_v15 = vpop.f32.mrf.mxu0 }
 0x120   : > { %v269_v16 = vadd.f32 %v268_v15, %v242_v14 }
 0x122   : > { %v680_v17 = vmul.f32 -1.442695, %v269_v16 }
 0x124   : > { %780 = vpow2.f32 %v680_v17  ;;  %v718_v17 = vld [vmem:[%s1123_s1 + $0x10] sm:$0xff] }
 0x12a   : > { %v781_v19 = vpop.eup %780 }
 0x12b   : > { %v275_v20 = vadd.f32 1.0, %v781_v19  ;;  %v698_v19 = vld [vmem:[%s1124_s2 + $0x20] sm:$0xff] }
 0x12d   : > { %782 = vrcp.f32 %v275_v20  ;;  %v287_v26 = vand.u32 2147483648, %v275_v20  ;;  %v285_v28 = vand.u32 2147483647, %v275_v20  ;;  %vm281_vm7 = vweird.f32 %v275_v20 }
 0x12e   : > { %784 = vtanh.f32 %v267_v23 }
 0x12f   : > { %v288_v30 = vor.u32 1.1754944e-38, %v287_v26  ;;  %vm286_vm9 = vcmp.eq.f32.partialorder %v285_v28, 8.507059e+37 }
 0x133   : > { %v783_v22 = vpop.eup %782 }
 0x134   : > { %v277_v24 = vmul.f32 %v783_v22, %v275_v20  ;;  %vm282_vm6 = vweird.f32 %v783_v22  ;;  %v785_v32 = vpop.eup %784 }
 0x135   : > { %vm283_vm8 = vmor %vm281_vm7, %vm282_vm6  ;;  %vm431_vm6 = vcmp.ge.s32.totalorder %v999_v6, 4 }
 0x136   : > { %v278_v25 = vsub.f32 1.0, %v277_v24  ;;  %vm704_vm7 = vmpackc.low %vm898_vm3, %vm431_vm6 }
 0x138   : > { %v279_v27 = vmul.f32 %v783_v22, %v278_v25 }
 0x13a   : > { %v280_v29 = vadd.f32 %v783_v22, %v279_v27 }
 0x13c   : > { %v284_v31 = vsel %vm283_vm8, %v783_v22, %v280_v29 }
 0x13d   : > { %v289_v33 = vsel %vm286_vm9, %v288_v30, %v284_v31 }
 0x13e   : > { %v291_v34 = vmul.f32 %v785_v32, %v289_v33 }
 0x140   : > { %v292_v35 = vpack.c.bf16 %v291_v34, %v291_v34 }
 0x142   : > { %v308_v36 = vsel %vm253_vm1, %v292_v35, 0 }
 0x143   : > { %317 = vmatpush.bf16.msra.mxu1 %v308_v36 }
 0x146   : > { %681 = vmatmul.msk.bf16.vlgmr.msra.gmra.mxu1 %vm303_vm10, %v302_v37 }
 0x1c3   : > { %v319_v39 = vpop.f32.mrf.mxu1 }
 0x1c4   : > { %v320_v40 = vadd.f32 %v319_v39, %v295_v38 }
 0x1c6   : > { %v1011_v41 = vadd.f32 %v320_v40, %v982_v0 }
 0x1c8   : > { %327 = vrot.lane.b32.xlu1 %v1011_v41, %s900_s20  ;;  %331 = vrot.lane.b32.xlu0 %v1011_v41, %s901_s22  ;;  %s712_s20 = sshll.u32 %s950_s19, 3 }
 0x1c9   : > { %s554_s28 = scalar_lea.hbm %s1125_s3, %s712_s20  ;;  %s568_s7 = scalar_lea.hbm %s1126_s4, %s712_s20 }
 0x1ca   : > { %s558_s5 = sshll.u32 %s554_s28, 4  ;;  %s559_s5 = int_to_ptr.hbm [resolvable:$true] %s558_s5 }
 0x1d0   : > { %344 = vperm.xlu0 %776, %v684_v42   ;;  %407 = vrot.lane.b32.xlu1 %v717_v44, %s896_s10 }
 0x1d8   : > { %454 = vperm.xlu0 %776, %v1021_v43  }
 0x1e0   : > { %778 = vset.pattern.permute.xlu0 %v899_v18 }
 0x1e1   : > { %298 = vperm.xlu0 %778, %v993_v2  }
 0x23a   : > { %v332_v46 = vpop.permute.xlu0 %331  ;;  %v328_v49 = vpop.permute.xlu1 %327 }
 0x23b   : > { %v333_v47 = vsel %vm330_vm11, %v332_v46, 0.0  ;;  %v691_v51 = vpack.c.bf16 %v1011_v41, %v328_v49 }
 0x23c   : > { %v335_v48 = vpack.c.bf16 %v333_v47, %v333_v47 }
 0x23e   : > { %v361_v50 = vsel %vm253_vm1, %v335_v48, 0 }
 0x23f   : > { %369 = vmatpush.bf16.msra.mxu2 %v361_v50 }
 0x242   : > { %v345_v59 = vpop.permute.xlu0 %344  ;;  %v408_v12 = vpop.permute.xlu1 %407 }
 0x243   : > { %692 = vmatpush.bf16.msk.msra.mxu2 %vm690_vm13, %v691_v51 }
 0x246   : > { %693 = vmatmul.msk.bf16.vlgmr.msra.gmra.mxu2 %vm249_vm5, %v717_v44 }
 0x24a   : > { %v455_v27 = vpop.permute.xlu0 %454 }
 0x2c9   : > { %v372_v52 = vpop.f32.mrf.mxu2 }
 0x2ca   : > { %v373_v61 = vadd.f32 %v372_v52, %v345_v59 }
 0x2d1   : > { %v374_v54 = vpop.f32.mrf.mxu2 }
 0x2d2   : > { %v375_v55 = vadd.f32 %v374_v54, %v350_v53 }
 0x2d4   : > { %v694_v56 = vmul.f32 -1.442695, %v375_v55  ;;  %v299_v55 = vpop.permute.xlu0 %298 }
 0x2d6   : > { %786 = vpow2.f32 %v694_v56 }
 0x2dc   : > { %v787_v57 = vpop.eup %786 }
 0x2dd   : > { %v381_v58 = vadd.f32 1.0, %v787_v57 }
 0x2df   : > { %788 = vrcp.f32 %v381_v58  ;;  %v393_v0 = vand.u32 2147483648, %v381_v58  ;;  %v391_v2 = vand.u32 2147483647, %v381_v58  ;;  %vm387_vm15 = vweird.f32 %v381_v58 }
 0x2e0   : > { %790 = vtanh.f32 %v373_v61 }
 0x2e1   : > { %v394_v4 = vor.u32 1.1754944e-38, %v393_v0  ;;  %vm392_vm2 = vcmp.eq.f32.partialorder %v391_v2, 8.507059e+37 }
 0x2e5   : > { %v789_v60 = vpop.eup %788 }
 0x2e6   : > { %v383_v62 = vmul.f32 %v789_v60, %v381_v58  ;;  %vm388_vm14 = vweird.f32 %v789_v60  ;;  %v791_v7 = vpop.eup %790 }
 0x2e7   : > { %vm389_vm0 = vmor %vm387_vm15, %vm388_vm14 }
 0x2e8   : > { %v384_v63 = vsub.f32 1.0, %v383_v62 }
 0x2ea   : > { %v385_v1 = vmul.f32 %v789_v60, %v384_v63 }
 0x2ec   : > { %v386_v3 = vadd.f32 %v789_v60, %v385_v1 }
 0x2ee   : > { %v390_v5 = vsel %vm389_vm0, %v789_v60, %v386_v3 }
 0x2ef   : > { %v395_v8 = vsel %vm392_vm2, %v394_v4, %v390_v5 }
 0x2f0   : > { %v397_v9 = vmul.f32 %v791_v7, %v395_v8 }
 0x2f2   : > { %v398_v10 = vpack.c.bf16 %v397_v9, %v397_v9 }
 0x2f4   : > { %v413_v11 = vsel %vm253_vm1, %v398_v10, 0 }
 0x2f5   : > { %422 = vmatpush.bf16.msra.mxu3 %v413_v11 }
 0x2f8   : > { %695 = vmatmul.msk.bf16.vlgmr.msra.gmra.mxu3 %vm303_vm10, %v408_v12 }
 0x37b   : > { %v424_v14 = vpop.f32.mrf.mxu3 }
 0x37c   : > { %v425_v15 = vadd.f32 %v424_v14, %v401_v13 }
 0x37e   : > { %v1043_v16 = vadd.f32 %v425_v15, %v1011_v41 }
 0x380   : > { %432 = vrot.lane.b32.xlu2 %v1043_v16, %s902_s8  ;;  %436 = vrot.lane.b32.xlu1 %v1043_v16, %s903_s9  ;;  %s812_s9 = sshra.s32 %s559_s5, 4  ;;  %s813_s9 = int_to_ptr.hbm [resolvable:$true] %s812_s9 }
 0x381   : > { %s814_s11 = scalar_lea.hbm %s813_s9, 8  ;;  %p819_p0 = scmp.lt.s32.totalorder %s813_s9, %s1125_s3 }
 0x382   : > { %p815_p11 = scmp.ne.s32.totalorder %s813_s9, %s814_s11  ;;  %p820_p1 = scmp.lt.s32.totalorder %s818_s14, %s814_s11 }
 0x383   : > { %v426_v49 = vpop.f32.mrf.mxu3 }
 0x384   : > { %p816_p12 = pnand %p815_p11, %p967_p5  ;;  %p821_p2 = por %p820_p1, %p819_p0 }
 0x386   : > { %p817_p13 = pneg %p816_p12 }
 0x388   : > { %512 = vrot.lane.b32.xlu2 %v718_v17, %s896_s10  ;;  %449 = vperm.xlu1 %773, %v698_v19   ;;  %s1067_s10 = sand.u32 1, %s884_s16   ;;  %p822_p3 = pnand %p821_p2, %p817_p13 }
 0x389   : > { %s669_s22 = sshll.u32 %s1067_s10, 3  ;;  %s539_s8 = scalar_lea.sflag [#allocation3], %s1067_s10 }
 0x38a   : > { %s192_s29 = scalar_lea.vmem [#allocation2], %s669_s22 }
 0x38b   : > { %s556_s30 = sshll.u32 %s192_s29, 4  ;;  %s557_s30 = int_to_ptr.vmem [resolvable:$true] %s556_s30 }
 0x390   : > { %505 = vperm.xlu2 %777, %v698_v19   ;;  %779 = vset.pattern.permute.xlu1 %v899_v18  ;;  %v1062_v18 = vpop.f32.mrf.mxu1 }
 0x391   : > { %404 = vperm.xlu1 %779, %v685_v45  }
 0x399   : > { %509 = vperm.xlu1 %779, %v1021_v43  }
 0x3da   : > { %v433_v23 = vpop.permute.xlu2 %432 }
 0x3db   : > { %v705_v25 = vpack.c.bf16 %v1043_v16, %v433_v23 }
 0x3e2   : > { %v513_v48 = vpop.permute.xlu2 %512 }
 0x3ea   : > { %v506_v50 = vpop.permute.xlu2 %505 }
 0x3f2   : > { %v437_v20 = vpop.permute.xlu1 %436 }
 0x3f3   : > { %v438_v21 = vsel %vm435_vm4, %v437_v20, 0.0 }
 0x3f4   : > { %v440_v22 = vpack.c.bf16 %v438_v21, %v438_v21 }
 0x3f6   : > { %v466_v24 = vsel %vm253_vm1, %v440_v22, 0 }
 0x3f7   : > { %474 = vmatpush.bf16.msrb.mxu1 %v466_v24 }
 0x3fa   : > { %v450_v32 = vpop.permute.xlu1 %449 }
 0x3fb   : > { %706 = vmatpush.bf16.msk.msrb.mxu1 %vm704_vm7, %v705_v25 }
 0x3fe   : > { %707 = vmatmul.msk.bf16.vlgmr.msrb.gmra.mxu1 %vm249_vm5, %v718_v17 }
 0x403   : > { %v405_v51 = vpop.permute.xlu1 %404 }
 0x404   : > { %v427_v56 = vadd.f32 %v426_v49, %v405_v51 }
 0x47b   : > { %v477_v26 = vpop.f32.mrf.mxu1 }
 0x47c   : > { %v478_v34 = vadd.f32 %v477_v26, %v450_v32 }
 0x483   : > { %v479_v28 = vpop.f32.mrf.mxu1 }
 0x484   : > { %v480_v29 = vadd.f32 %v479_v28, %v455_v27 }
 0x486   : > { %v708_v30 = vmul.f32 -1.442695, %v480_v29 }
 0x488   : > { %792 = vpow2.f32 %v708_v30 }
 0x48e   : > { %v793_v6 = vpop.eup %792 }
 0x48f   : > { %v486_v31 = vadd.f32 1.0, %v793_v6 }
 0x491   : > { %794 = vrcp.f32 %v486_v31  ;;  %v498_v37 = vand.u32 2147483648, %v486_v31  ;;  %v496_v39 = vand.u32 2147483647, %v486_v31  ;;  %vm492_vm5 = vweird.f32 %v486_v31 }
 0x492   : > { %796 = vtanh.f32 %v478_v34 }
 0x493   : > { %v499_v41 = vor.u32 1.1754944e-38, %v498_v37  ;;  %vm497_vm9 = vcmp.eq.f32.partialorder %v496_v39, 8.507059e+37 }
 0x497   : > { %v795_v33 = vpop.eup %794 }
 0x498   : > { %v488_v35 = vmul.f32 %v795_v33, %v486_v31  ;;  %vm493_vm3 = vweird.f32 %v795_v33  ;;  %v797_v43 = vpop.eup %796 }
 0x499   : > { %vm494_vm8 = vmor %vm492_vm5, %vm493_vm3 }
 0x49a   : > { %v489_v36 = vsub.f32 1.0, %v488_v35 }
 0x49c   : > { %v490_v38 = vmul.f32 %v795_v33, %v489_v36 }
 0x49e   : > { %v491_v40 = vadd.f32 %v795_v33, %v490_v38 }
 0x4a0   : > { %v495_v42 = vsel %vm494_vm8, %v795_v33, %v491_v40 }
 0x4a1   : > { %v500_v44 = vsel %vm497_vm9, %v499_v41, %v495_v42 }
 0x4a2   : > { %v502_v45 = vmul.f32 %v797_v43, %v500_v44 }
 0x4a4   : > { %v503_v46 = vpack.c.bf16 %v502_v45, %v502_v45 }
 0x4a6   : > { %v518_v47 = vsel %vm253_vm1, %v503_v46, 0 }
 0x4a7   : > { %527 = vmatpush.bf16.msrb.mxu3 %v518_v47 }
 0x4aa   : > { %709 = vmatmul.msk.bf16.vlgmr.msrb.gmra.mxu3 %vm303_vm10, %v513_v48 }
 0x52d   : > { %v529_v52 = vpop.f32.mrf.mxu3 }
 0x52e   : > { %v530_v53 = vadd.f32 %v529_v52, %v506_v50 }
 0x530   : > { %v534_v54 = vadd.f32 %v530_v53, %v1043_v16 }
 0x532   : > { %536 = vst [vmem:[%s192_s29] sm:$0xff] %v534_v54 }
 0x533   : > { %825 = shalt.err (!%p822_p3)
}
 0x534   : > { %719 = dma.vmem_to_hbm [thread:$0]  (%p967_p5), %s557_s30, 128, %s559_s5, %s539_s8   ;;  %v322_v57 = vadd.f32 %v1062_v18, %v299_v55  ;;  %v510_v58 = vpop.permute.xlu1 %509 }
 0x535   : > { %v531_v59 = vpop.f32.mrf.mxu3  ;;  %s199_s20 = scalar_lea.vmem [#allocation4], %s669_s22  ;;  %s572_s29 = sshll.u32 %s568_s7, 4  ;;  %s573_s29 = int_to_ptr.hbm [resolvable:$true] %s572_s29 }
 0x536   : > { %s570_s28 = sshll.u32 %s199_s20, 4  ;;  %v430_v60 = vadd.f32 %v427_v56, %v322_v57  ;;  %v532_v61 = vadd.f32 %v531_v59, %v510_v58  ;;  %s544_s19 = scalar_lea.sflag [#allocation5], %s1067_s10  ;;  %s571_s28 = int_to_ptr.vmem [resolvable:$true] %s570_s28 }
 0x537   : > { %s840_s6 = sshra.s32 %s573_s29, 4  ;;  %s846_s22 = scalar_lea.hbm %s1126_s4, 16  ;;  %s841_s6 = int_to_ptr.hbm [resolvable:$true] %s840_s6 }
 0x538   : > { %v535_v62 = vadd.f32 %v532_v61, %v430_v60  ;;  %s842_s9 = scalar_lea.hbm %s841_s6, 8  ;;  %p847_p9 = scmp.lt.s32.totalorder %s841_s6, %s1126_s4 }
 0x539   : > { %p843_p4 = scmp.ne.s32.totalorder %s841_s6, %s842_s9  ;;  %p848_p10 = scmp.lt.s32.totalorder %s846_s22, %s842_s9 }
 0x53a   : > { %537 = vst [vmem:[%s199_s20] sm:$0xff] %v535_v62 }
 0x53b   : > { %p844_p7 = pnand %p843_p4, %p967_p5  ;;  %p849_p11 = por %p848_p10, %p847_p9 }
 0x53d   : > { %p845_p8 = pneg %p844_p7 }
 0x53f   : > { %p850_p12 = pnand %p849_p11, %p845_p8 }
 0x541   : > { %853 = shalt.err (!%p850_p12)
}
 0x542   : > { %720 = dma.vmem_to_hbm [thread:$0]  (%p967_p5), %s571_s28, 128, %s573_s29, %s544_s19  }
 0x543 PF: > { %p730_p13 = scmp.ge.s32.totalorder %s892_s18, 2  ;;  %s584_s10 = sand.u32 1, %s880_s15  }
 0x544   : > { %s585_s11 = scalar_lea.sflag [#allocation3], %s584_s10 }
 0x545   : > { %p724_p0 = pnand %p730_p13, %p971_p6 }
 0x547   : > { %p725_p1 = pneg %p724_p0 }
 0x549   : > { %871 = dma.done.wait (%p725_p1), %s585_s11, 128  }
 0x54a   : > { %873 = vsyncadd (%p725_p1), %s585_s11, 4294967168  ;;  %s595_s12 = scalar_lea.sflag [#allocation5], %s584_s10 }
 0x54b   : > { %875 = dma.done.wait (%p725_p1), %s595_s12, 128  }
 0x54c   : > { %877 = vsyncadd (%p725_p1), %s595_s12, 4294967168  ;;  %p18_p5 = scmp.ge.s32.totalorder %s954_s21, 4   ;;  %s1129_s15 = smov %s884_s16 }
 0x54d   : > { %s1130_s16 = smov %s888_s17  ;;  %s1131_s17 = smov %s965_s24 }
 0x54e   : > { %s1132_s18 = smov %s954_s21  ;;  %20 = sbr.rel (!%p18_p5) target bundleno = 5 (0x5), region = 88 }
 0x553   :  { %601 = vsyncpa [#allocation3], 1 }
 0x554   :  { %603 = vsyncpa [#allocation3 + $0x1], 1 }
 0x555   :  { %604 = vsyncpa [#allocation5], 1 }
 0x556   :  { %606 = vsyncpa [#allocation5 + $0x1], 1 }

</bundles_post_ra>
